<compile_context>
chip_gen: v5e
topology: v5e:2x2
jax: 0.10.0
libtpu: 0.0.40
codegen_flags: <defaults>
</compile_context>

<pallas_src>
import functools

import jax
import jax.numpy as jnp
import numpy as np
from jax import lax
from jax.experimental import pallas as pl
from jax.experimental.pallas import tpu as pltpu

LANES = 128
ACC_ROWS = 32      # resident accumulator rows per core = 4 independent (8,128) chains
CHUNK_ROWS = 512   # elementwise compute chunk (bounds Mosaic temps to ~256 KiB each)


def _cdiv(a, b):
    return -(-a // b)


def _round_up(x, m):
    return _cdiv(x, m) * m


def _device_kind():
    try:
        return jax.devices()[0].device_kind.lower()
    except Exception:  # pragma: no cover - defensive
        return ""


def _tuning():
    """(block_rows, num_core_splits, vmem_limit_bytes) per TPU generation."""
    kind = _device_kind()
    if "v7" in kind:
        # 64 MiB physical VMEM per TC, 2 TCs/chip.
        return 4096, 2, 48 << 20
    if "v6" in kind:
        # 128 MiB physical VMEM; 8192-row blocks amortize per-step overhead.
        return 8192, 1, 96 << 20
    # v5e and others: 128 MiB physical VMEM (scoped default is only 16 MiB).
    return 4096, 1, 64 << 20


def _scaled_mse_kernel(pred_ref, cp_ref, result_ref, out_ref, *,
                       lambda_, half_pred_scale, half_cp_scale,
                       block_rows, chunk_rows, steps, num_splits,
                       rem_base, needs_mask):
    c = pl.program_id(0)   # core split (parallel)
    t = pl.program_id(1)   # reduction step (arbitrary)

    @pl.when(t == 0)
    def _():
        out_ref[...] = jnp.zeros_like(out_ref)

    n_chunks = block_rows // chunk_rows

    def accumulate(masked):
        # Remaining valid elements in THIS core's last block (host-precomputed
        # base keeps all in-kernel index math small -> no int32 overflow).
        rem = (rem_base - c * (block_rows * LANES)) if masked else None

        def chunk_body(i, carry):
            if n_chunks == 1:
                r0 = 0
            else:
                r0 = pl.multiple_of(i * chunk_rows, chunk_rows)
            p = pred_ref[pl.ds(r0, chunk_rows), :].astype(jnp.float32)
            q = cp_ref[pl.ds(r0, chunk_rows), :].astype(jnp.float32)
            res = result_ref[pl.ds(r0, chunk_rows), :].astype(jnp.float32)

            # sigmoid(x) == 0.5 * tanh(0.5 * x) + 0.5  (EUP tanh, no f32 divide)
            wdl_pred = 0.5 * jnp.tanh(p * half_pred_scale) + 0.5
            wdl_cp = 0.5 * jnp.tanh(q * half_cp_scale) + 0.5
            wdl_target = lambda_ * wdl_cp + (1.0 - lambda_) * res
            diff = wdl_pred - wdl_target
            dsq = diff * diff

            if masked:
                row = lax.broadcasted_iota(jnp.int32, (chunk_rows, LANES), 0)
                lane = lax.broadcasted_iota(jnp.int32, (chunk_rows, LANES), 1)
                idx = (r0 + row) * LANES + lane        # bounded by block_rows*128
                dsq = jnp.where(idx < rem, dsq, 0.0)   # select: garbage never propagates

            # Sublane-aligned partial sums into the resident (32,128) slab:
            # 4 independent (8,128) accumulation chains, pure VPU adds.
            out_ref[...] += jnp.sum(
                dsq.reshape(chunk_rows // ACC_ROWS, ACC_ROWS, LANES), axis=0)
            return carry

        if n_chunks == 1:
            chunk_body(0, None)
        else:
            lax.fori_loop(0, n_chunks, chunk_body, None)

    if needs_mask:
        # Only the final reduction step can contain invalid (ragged / OOB) rows.
        @pl.when(t == steps - 1)
        def _():
            accumulate(True)

        @pl.when(t != steps - 1)
        def _():
            accumulate(False)
    else:
        accumulate(False)


def scaled_mse_loss(pred, cp, result, *, lambda_, nnue_2_score, cp_scaling,
                    block_rows=None, num_splits=None, vmem_limit_bytes=None):
    """Pallas TPU implementation of ScaledMSELoss.forward (returns a scalar)."""

    def _prep(x):
        x = jnp.asarray(x)
        if not jnp.issubdtype(x.dtype, jnp.floating) or x.dtype == jnp.float64:
            x = x.astype(jnp.float32)
        return x.reshape(-1)

    pred = _prep(pred)
    cp = _prep(cp)
    result = _prep(result)
    n = pred.shape[0]

    def_blk, def_splits, def_vmem = _tuning()
    if block_rows is None:
        block_rows = def_blk
    if num_splits is None:
        num_splits = def_splits
    if vmem_limit_bytes is None:
        vmem_limit_bytes = def_vmem

    # Lane-granule pad only (<= 127 elements). Padded elements contribute
    # exactly zero: sigmoid(0) = 0.5 and target = lambda*0.5 + (1-lambda)*0.5.
    rows = _cdiv(n, LANES)
    pad = rows * LANES - n
    if pad:
        pred = jnp.pad(pred, (0, pad))
        cp = jnp.pad(cp, (0, pad))
        result = jnp.pad(result, (0, pad), constant_values=0.5)

    blk_rows = _round_up(min(block_rows, _round_up(rows, ACC_ROWS)), ACC_ROWS)
    chunk_rows = CHUNK_ROWS if blk_rows % CHUNK_ROWS == 0 else blk_rows

    total_blocks = _cdiv(rows, blk_rows)
    num_splits = max(1, min(num_splits, total_blocks))
    steps = _cdiv(total_blocks, num_splits)
    needs_mask = steps * num_splits * blk_rows > rows
    # Valid elements remaining at the start of the last step's block of core 0.
    rem_base = (rows - (steps - 1) * num_splits * blk_rows) * LANES

    p2 = pred.reshape(rows, LANES)
    c2 = cp.reshape(rows, LANES)
    r2 = result.reshape(rows, LANES)

    def in_map(c, t):
        # Interleaved block assignment: all ragged/duplicate blocks land on the
        # final step. Clamp so a core past the end re-reads the last real block
        # (its contribution is fully masked to zero) instead of an OOB DMA.
        return (jnp.minimum(t * num_splits + c, total_blocks - 1), 0)

    in_spec = pl.BlockSpec((blk_rows, LANES), in_map)
    # One resident (32,128) partial-sum slab per core split, written back once.
    out_spec = pl.BlockSpec((ACC_ROWS, LANES), lambda c, t: (c, 0))

    kernel = functools.partial(
        _scaled_mse_kernel,
        lambda_=float(lambda_),
        half_pred_scale=0.5 * float(nnue_2_score) / float(cp_scaling),
        half_cp_scale=0.5 / float(cp_scaling),
        block_rows=blk_rows,
        chunk_rows=chunk_rows,
        steps=steps,
        num_splits=num_splits,
        rem_base=rem_base,
        needs_mask=needs_mask,
    )

    partials = pl.pallas_call(
        kernel,
        out_shape=jax.ShapeDtypeStruct((num_splits * ACC_ROWS, LANES), jnp.float32),
        grid_spec=pltpu.PrefetchScalarGridSpec(
            num_scalar_prefetch=0,
            grid=(num_splits, steps),
            in_specs=[in_spec, in_spec, in_spec],
            out_specs=out_spec,
        ),
        compiler_params=pltpu.CompilerParams(
            dimension_semantics=("parallel", "arbitrary"),
            vmem_limit_bytes=int(vmem_limit_bytes)),
    )(p2, c2, r2)

    # Final tiny reduction (<= num_splits*32*128 f32) + mean in plain XLA.
    return jnp.sum(partials) / jnp.float32(n)


def _reference(pred, cp, result, *, lambda_, nnue_2_score, cp_scaling):
    wdl_pred = jax.nn.sigmoid(pred * nnue_2_score / cp_scaling)
    wdl_cp = jax.nn.sigmoid(cp / cp_scaling)
    wdl_target = lambda_ * wdl_cp + (1 - lambda_) * result
    return jnp.mean(jnp.square(wdl_pred - wdl_target))


if __name__ == "__main__":
    # Module hyper-parameters (deterministic, in-script).
    lambda_ = 0.75
    nnue_2_score = 600
    cp_scaling = 410

    key = jax.random.PRNGKey(0)
    k1, k2, k3 = jax.random.split(key, 3)

    def check(B, **kw):
        pred = jax.random.normal(k1, (B,), dtype=jnp.float32) * 2.0
        cp = jax.random.normal(k2, (B,), dtype=jnp.float32) * 300.0
        result = jax.random.uniform(k3, (B,), dtype=jnp.float32)
        loss = scaled_mse_loss(
            pred, cp, result,
            lambda_=lambda_, nnue_2_score=nnue_2_score, cp_scaling=cp_scaling,
            **kw)
        loss = jax.block_until_ready(loss)
        ref = _reference(pred, cp, result,
                         lambda_=lambda_, nnue_2_score=nnue_2_score,
                         cp_scaling=cp_scaling)
        np.testing.assert_allclose(np.asarray(loss), np.asarray(ref),
                                   rtol=1e-4, atol=1e-5)

    # Lane-aligned batch (no mask path when rows divide evenly).
    check(4096)
    # Ragged batch (exercises <=127-element granule pad + last-step mask).
    check(1000)
    # Multi-step reduction with a partial final block (exercises accumulator
    # init/gating, interleaved block mapping and the clamped core-split block).
    check(40000, block_rows=64)

    print("KERNEL_OK")
</pallas_src>

<mosaic_0001>
module attributes {stable_mosaic.version = 11 : i64} {
  func.func @_scaled_mse_kernel(%arg0: i32, %arg1: i32, %arg2: memref<32x128xf32, #tpu.memory_space<vmem>>, %arg3: memref<32x128xf32, #tpu.memory_space<vmem>>, %arg4: memref<32x128xf32, #tpu.memory_space<vmem>>, %arg5: memref<32x128xf32, #tpu.memory_space<vmem>>) attributes {dimension_semantics = [#tpu.dimension_semantics<parallel>, #tpu.dimension_semantics<arbitrary>], iteration_bounds = array<i64: 1, 1>, scalar_prefetch = 0 : i64, scratch_operands = 0 : i64, tpu.core_type = #tpu.core_type<tc>, window_params = [{transform_indices = @transform_0, window_bounds = array<i64: 32, 128>}, {transform_indices = @transform_1, window_bounds = array<i64: 32, 128>}, {transform_indices = @transform_2, window_bounds = array<i64: 32, 128>}, {transform_indices = @transform_3, window_bounds = array<i64: 32, 128>}]} {
    %c0_i32 = arith.constant 0 : i32
    %0 = arith.cmpi eq, %arg1, %c0_i32 : i32
    %1 = arith.extui %0 : i1 to i32
    %c0_i32_0 = arith.constant 0 : i32
    %2 = arith.cmpi ne, %1, %c0_i32_0 : i32
    scf.if %2 {
      %cst_18 = arith.constant 0.000000e+00 : f32
      %32 = vector.broadcast %cst_18 : f32 to vector<32x128xf32>
      %c0_19 = arith.constant 0 : index
      %c0_20 = arith.constant 0 : index
      %33 = vector.load %arg5[%c0_19, %c0_20] : memref<32x128xf32, #tpu.memory_space<vmem>>, vector<32x128xf32>
      tpu.vector_store %arg5[%c0_19, %c0_20], %32 {strides = array<i32>} : memref<32x128xf32, #tpu.memory_space<vmem>>, vector<32x128xf32>,
    } else {
    }
    %c0 = arith.constant 0 : index
    %c0_1 = arith.constant 0 : index
    %3 = vector.load %arg2[%c0, %c0_1] : memref<32x128xf32, #tpu.memory_space<vmem>>, vector<32x128xf32>
    %c0_2 = arith.constant 0 : index
    %c0_3 = arith.constant 0 : index
    %4 = vector.load %arg3[%c0_2, %c0_3] : memref<32x128xf32, #tpu.memory_space<vmem>>, vector<32x128xf32>
    %c0_4 = arith.constant 0 : index
    %c0_5 = arith.constant 0 : index
    %5 = vector.load %arg4[%c0_4, %c0_5] : memref<32x128xf32, #tpu.memory_space<vmem>>, vector<32x128xf32>
    %cst = arith.constant 0.731707335 : f32
    %6 = vector.broadcast %cst : f32 to vector<32x128xf32>
    %7 = arith.mulf %3, %6 : vector<32x128xf32>
    %8 = math.tanh %7 : vector<32x128xf32>
    %cst_6 = arith.constant 5.000000e-01 : f32
    %9 = vector.broadcast %cst_6 : f32 to vector<32x128xf32>
    %10 = arith.mulf %9, %8 : vector<32x128xf32>
    %cst_7 = arith.constant 5.000000e-01 : f32
    %11 = vector.broadcast %cst_7 : f32 to vector<32x128xf32>
    %12 = arith.addf %10, %11 : vector<32x128xf32>
    %cst_8 = arith.constant 0.0012195122 : f32
    %13 = vector.broadcast %cst_8 : f32 to vector<32x128xf32>
    %14 = arith.mulf %4, %13 : vector<32x128xf32>
    %15 = math.tanh %14 : vector<32x128xf32>
    %cst_9 = arith.constant 5.000000e-01 : f32
    %16 = vector.broadcast %cst_9 : f32 to vector<32x128xf32>
    %17 = arith.mulf %16, %15 : vector<32x128xf32>
    %cst_10 = arith.constant 5.000000e-01 : f32
    %18 = vector.broadcast %cst_10 : f32 to vector<32x128xf32>
    %19 = arith.addf %17, %18 : vector<32x128xf32>
    %cst_11 = arith.constant 7.500000e-01 : f32
    %20 = vector.broadcast %cst_11 : f32 to vector<32x128xf32>
    %21 = arith.mulf %20, %19 : vector<32x128xf32>
    %cst_12 = arith.constant 2.500000e-01 : f32
    %22 = vector.broadcast %cst_12 : f32 to vector<32x128xf32>
    %23 = arith.mulf %22, %5 : vector<32x128xf32>
    %24 = arith.addf %21, %23 : vector<32x128xf32>
    %25 = arith.subf %12, %24 : vector<32x128xf32>
    %26 = arith.mulf %25, %25 : vector<32x128xf32>
    %c0_13 = arith.constant 0 : index
    %c0_14 = arith.constant 0 : index
    %27 = vector.load %arg5[%c0_13, %c0_14] : memref<32x128xf32, #tpu.memory_space<vmem>>, vector<32x128xf32>
    %28 = vector.shape_cast %26 : vector<32x128xf32> to vector<1x32x128xf32>
    %cst_15 = arith.constant dense<0.000000e+00> : vector<32x128xf32>
    %29 = vector.multi_reduction <add>, %28, %cst_15 [0] : vector<1x32x128xf32> to vector<32x128xf32>
    %30 = arith.addf %27, %29 : vector<32x128xf32>
    %c0_16 = arith.constant 0 : index
    %c0_17 = arith.constant 0 : index
    %31 = vector.load %arg5[%c0_16, %c0_17] : memref<32x128xf32, #tpu.memory_space<vmem>>, vector<32x128xf32>
    tpu.vector_store %arg5[%c0_16, %c0_17], %30 {strides = array<i32>} : memref<32x128xf32, #tpu.memory_space<vmem>>, vector<32x128xf32>,
    return
  }
  func.func @transform_0(%arg0: i32, %arg1: i32) -> (i32, i32) {
    %c1_i32 = arith.constant 1 : i32
    %0 = arith.muli %arg1, %c1_i32 : i32
    %1 = arith.addi %0, %arg0 : i32
    %c0_i32 = arith.constant 0 : i32
    %2 = arith.minsi %1, %c0_i32 : i32
    %c0_i32_0 = arith.constant 0 : i32
    %c0_i32_1 = arith.constant 0 : i32
    return %2, %c0_i32_0 : i32, i32
  }
  func.func @transform_1(%arg0: i32, %arg1: i32) -> (i32, i32) {
    %c1_i32 = arith.constant 1 : i32
    %0 = arith.muli %arg1, %c1_i32 : i32
    %1 = arith.addi %0, %arg0 : i32
    %c0_i32 = arith.constant 0 : i32
    %2 = arith.minsi %1, %c0_i32 : i32
    %c0_i32_0 = arith.constant 0 : i32
    %c0_i32_1 = arith.constant 0 : i32
    return %2, %c0_i32_0 : i32, i32
  }
  func.func @transform_2(%arg0: i32, %arg1: i32) -> (i32, i32) {
    %c1_i32 = arith.constant 1 : i32
    %0 = arith.muli %arg1, %c1_i32 : i32
    %1 = arith.addi %0, %arg0 : i32
    %c0_i32 = arith.constant 0 : i32
    %2 = arith.minsi %1, %c0_i32 : i32
    %c0_i32_0 = arith.constant 0 : i32
    %c0_i32_1 = arith.constant 0 : i32
    return %2, %c0_i32_0 : i32, i32
  }
  func.func @transform_3(%arg0: i32, %arg1: i32) -> (i32, i32) {
    %c0_i32 = arith.constant 0 : i32
    %c0_i32_0 = arith.constant 0 : i32
    return %arg0, %c0_i32 : i32, i32
  }
}

</mosaic_0001>

<bundles_post_ra>
// kernel: tpu_custom_call.1
= control target key start
LH: loop header
LB: loop body
LE: loop exit
PB: predicated region body
PF: predicated region fallthrough
CT: control target
= control target key end

     0   :  { %8 = vsyncpa [#allocation3], 0  ;;  %s381_s0 = inlined_call_operand.hbm [shape: f32[32,128], index: 0, kind: input, shape index: {}]   ;;  %s382_s1 = inlined_call_operand.hbm [shape: f32[32,128], index: 1, kind: input, shape index: {}]   ;;  %s383_s2 = inlined_call_operand.hbm [shape: f32[32,128], index: 2, kind: input, shape index: {}]   ;;  %s384_s3 = inlined_call_operand.hbm [shape: f32[32,128], index: 3, kind: output, shape index: {}]  }
   0x1   :  { %9 = vsyncpa [#allocation6], 0 }
   0x2   :  { %10 = vsyncpa [#allocation4], 0  ;;  %s40_s14 = sshll.u32 %s382_s1, 4  ;;  %s331_s15 = smov [#allocation5]   ;;  %s41_s14 = int_to_ptr.hbm [resolvable:$true] %s40_s14 }
   0x3   :  { %s42_s16 = sshll.u32 %s331_s15, 4  ;;  %s21_s19 = sshll.u32 %s381_s0, 4  ;;  %s43_s16 = int_to_ptr.vmem [resolvable:$true] %s42_s16  ;;  %s22_s19 = int_to_ptr.hbm [resolvable:$true] %s21_s19 }
   0x4   :  { %s332_s20 = smov 128   ;;  %s333_s21 = smov 8  }
   0x5   :  { %48 = dma.hbm_to_vmem [thread:$0]  %s41_s14, 512, %s43_s16, [#allocation6], %s332_s20, %s332_s20, %s333_s21  }
   0x6   :  { %s334_s22 = smov [#allocation2]   ;;  %s59_s1 = sshll.u32 %s383_s2, 4  ;;  %s60_s1 = int_to_ptr.hbm [resolvable:$true] %s59_s1 }
   0x7   :  { %s23_s23 = sshll.u32 %s334_s22, 4  ;;  %s335_s0 = smov [#allocation7]   ;;  %s24_s23 = int_to_ptr.vmem [resolvable:$true] %s23_s23 }
   0x8   :  { %29 = dma.hbm_to_vmem [thread:$0]  %s22_s19, 512, %s24_s23, [#allocation3], %s332_s20, %s332_s20, %s333_s21  }
   0x9   :  { %s61_s26 = sshll.u32 %s335_s0, 4  ;;  %s62_s26 = int_to_ptr.vmem [resolvable:$true] %s61_s26 }
   0xa   :  { %67 = dma.hbm_to_vmem [thread:$0]  %s60_s1, 512, %s62_s26, [#allocation6], %s332_s20, %s332_s20, %s333_s21  }
   0xb   :  { %325 = dma.done.wait [#allocation3], 512  }
   0xc   :  { %326 = vsyncadd [#allocation3], 4294966784 }
   0xd   :  { %327 = dma.done.wait [#allocation6], 1024  }
   0xe   :  { %328 = vsyncadd [#allocation6], 4294966272  ;;  %v100_v0 = vld [vmem:[#allocation2] sm:$0xff]  ;;  %v101_v4 = vld [vmem:[#allocation2 + $0x8] sm:$0xff]  ;;  %s336_s2 = smov [#allocation8]   ;;  %s186_s30 = sshll.u32 %s384_s3, 4  ;;  %s187_s30 = int_to_ptr.hbm [resolvable:$true] %s186_s30 }
   0xf   :  { %v104_v1 = vld [vmem:[#allocation5] sm:$0xff]  ;;  %v112_v2 = vmul.f32 0.73170733, %v100_v0  ;;  %v105_v5 = vld [vmem:[#allocation5 + $0x8] sm:$0xff]  ;;  %v113_v6 = vmul.f32 0.73170733, %v101_v4 }
  0x10   :  { %v128_v3 = vmul.f32 0.0012195122, %v104_v1  ;;  %v102_v7 = vld [vmem:[#allocation2 + $0x10] sm:$0xff]  ;;  %v129_v8 = vmul.f32 0.0012195122, %v105_v5  ;;  %v103_v10 = vld [vmem:[#allocation2 + $0x18] sm:$0xff] }
  0x11   :  { %213 = vtanh.f32 %v112_v2  ;;  %v106_v9 = vld [vmem:[#allocation5 + $0x10] sm:$0xff]  ;;  %v114_v11 = vmul.f32 0.73170733, %v102_v7  ;;  %v107_v13 = vld [vmem:[#allocation5 + $0x18] sm:$0xff]  ;;  %v115_v14 = vmul.f32 0.73170733, %v103_v10 }
  0x12   :  { %215 = vtanh.f32 %v128_v3  ;;  %v130_v12 = vmul.f32 0.0012195122, %v106_v9  ;;  %v131_v15 = vmul.f32 0.0012195122, %v107_v13  ;;  %v108_v18 = vld [vmem:[#allocation7] sm:$0xff]  ;;  %v109_v22 = vld [vmem:[#allocation7 + $0x8] sm:$0xff] }
  0x13   :  { %217 = vtanh.f32 %v113_v6  ;;  %v148_v27 = vmul.f32 0.25, %v108_v18  ;;  %v110_v29 = vld [vmem:[#allocation7 + $0x10] sm:$0xff]  ;;  %v149_v31 = vmul.f32 0.25, %v109_v22  ;;  %v111_v38 = vld [vmem:[#allocation7 + $0x18] sm:$0xff]  ;;  %s184_s27 = sshll.u32 %s336_s2, 4  ;;  %s185_s27 = int_to_ptr.vmem [resolvable:$true] %s184_s27 }
  0x14   :  { %219 = vtanh.f32 %v129_v8  ;;  %v150_v41 = vmul.f32 0.25, %v110_v29  ;;  %v151_v48 = vmul.f32 0.25, %v111_v38 }
  0x15   :  { %221 = vtanh.f32 %v114_v11 }
  0x16   :  { %223 = vtanh.f32 %v130_v12 }
  0x17   :  { %v214_v16 = vpop.eup %213  ;;  %225 = vtanh.f32 %v115_v14 }
  0x18   :  { %v216_v17 = vpop.eup %215  ;;  %227 = vtanh.f32 %v131_v15  ;;  %v120_v20 = vmul.f32 0.5, %v214_v16 }
  0x19   :  { %v218_v19 = vpop.eup %217  ;;  %v136_v21 = vmul.f32 0.5, %v216_v17 }
  0x1a   :  { %v220_v23 = vpop.eup %219  ;;  %v121_v24 = vmul.f32 0.5, %v218_v19  ;;  %v124_v34 = vadd.f32 0.5, %v120_v20 }
  0x1b   :  { %v222_v25 = vpop.eup %221  ;;  %v140_v26 = vadd.f32 0.5, %v136_v21  ;;  %v137_v28 = vmul.f32 0.5, %v220_v23 }
  0x1c   :  { %v224_v30 = vpop.eup %223  ;;  %v122_v32 = vmul.f32 0.5, %v222_v25  ;;  %v125_v40 = vadd.f32 0.5, %v121_v24 }
  0x1d   :  { %v226_v33 = vpop.eup %225  ;;  %v144_v35 = vmul.f32 0.75, %v140_v26  ;;  %v141_v36 = vadd.f32 0.5, %v137_v28  ;;  %v138_v37 = vmul.f32 0.5, %v224_v30 }
  0x1e   :  { %v228_v39 = vpop.eup %227  ;;  %v123_v42 = vmul.f32 0.5, %v226_v33  ;;  %v126_v47 = vadd.f32 0.5, %v122_v32 }
  0x1f   :  { %v152_v43 = vadd.f32 %v148_v27, %v144_v35  ;;  %v145_v44 = vmul.f32 0.75, %v141_v36  ;;  %v142_v45 = vadd.f32 0.5, %v138_v37  ;;  %v139_v46 = vmul.f32 0.5, %v228_v39 }
  0x20   :  { %v127_v53 = vadd.f32 0.5, %v123_v42 }
  0x21   :  { %v156_v49 = vsub.f32 %v124_v34, %v152_v43  ;;  %v153_v50 = vadd.f32 %v149_v31, %v145_v44  ;;  %v146_v51 = vmul.f32 0.75, %v142_v45  ;;  %v143_v52 = vadd.f32 0.5, %v139_v46 }
  0x23   :  { %v160_v54 = vmul.f32 %v156_v49, %v156_v49  ;;  %v157_v55 = vsub.f32 %v125_v40, %v153_v50  ;;  %v154_v56 = vadd.f32 %v150_v41, %v146_v51  ;;  %v147_v57 = vmul.f32 0.75, %v143_v52 }
  0x25   :  { %v161_v58 = vmul.f32 %v157_v55, %v157_v55  ;;  %v158_v59 = vsub.f32 %v126_v47, %v154_v56  ;;  %v155_v60 = vadd.f32 %v151_v48, %v147_v57  ;;  %176 = vst [vmem:[#allocation8] sm:$0xff] %v160_v54 }
  0x27   :  { %v162_v61 = vmul.f32 %v158_v59, %v158_v59  ;;  %v159_v62 = vsub.f32 %v127_v53, %v155_v60  ;;  %177 = vst [vmem:[#allocation8 + $0x8] sm:$0xff] %v161_v58 }
  0x29   :  { %v163_v63 = vmul.f32 %v159_v62, %v159_v62  ;;  %178 = vst [vmem:[#allocation8 + $0x10] sm:$0xff] %v162_v61 }
  0x2b   :  { %179 = vst [vmem:[#allocation8 + $0x18] sm:$0xff] %v163_v63 }
  0x2c   :  { %192 = dma.vmem_to_hbm [thread:$0]  %s185_s27, 512, %s187_s30, [#allocation4], %s332_s20, %s332_s20, %s333_s21  }
  0x2d   :  { %329 = dma.done.wait [#allocation4], 512  }
  0x2e   :  { %330 = vsyncadd [#allocation4], 4294966784 }
  0x2f   :  { %197 = vsyncpa [#allocation3], 1 }
  0x30   :  { %198 = vsyncpa [#allocation6], 1 }
  0x31   :  { %199 = vsyncpa [#allocation4], 1 }

</bundles_post_ra>
